<compile_context>
chip_gen: v6e
topology: v6e:2x2x1
jax: 0.10.0
libtpu: 0.0.40
codegen_flags: <defaults>
</compile_context>

<pallas_src>
import functools

import numpy as np
import jax
import jax.numpy as jnp
from jax.experimental import pallas as pl
from jax.experimental.pallas import tpu as pltpu

IN_CHANNELS = 3
OUT_CHANNELS = 1
KSIZE = 3
PAD = 1


def _make_tap_masks(H, W):
    """(K*K, 1, 1, H*W) f32 validity masks: 1 where the 3x3 tap is in-bounds."""
    i = np.arange(H)[:, None]
    j = np.arange(W)[None, :]
    masks = np.zeros((KSIZE * KSIZE, 1, 1, H * W), np.float32)
    for kh in range(KSIZE):
        for kw in range(KSIZE):
            ok = ((i + kh - PAD >= 0) & (i + kh - PAD < H)
                  & (j + kw - PAD >= 0) & (j + kw - PAD < W))
            masks[kh * KSIZE + kw, 0, 0, :] = ok.reshape(-1).astype(np.float32)
    return jnp.asarray(masks)


def _conv3x3_kernel(w_ref, b_ref, x_ref, m_ref, o_ref, *, N, cin, cout, H, W):
    # w_ref: SMEM f32[cout*cin*9]     (flattened (cout, cin, 3, 3))
    # b_ref: SMEM f32[cout]
    # x_ref: VMEM f32[N, cin, H*W]    (spatial flattened -> lane-dense)
    # m_ref: VMEM f32[9, 1, 1, H*W]   (per-tap boundary masks)
    # o_ref: VMEM f32[N, cout, H*W]   (lane-dense output)
    HW = H * W
    x = x_ref[...]                                       # (N, cin, HW)

    # Precompute the 9 shifted + masked tap planes once; reused for all
    # (cout, cin) pairs.  tap[t][..., p] == x[..., p + s] if in-bounds else 0.
    taps = []
    for kh in range(KSIZE):
        for kw in range(KSIZE):
            s = (kh - PAD) * W + (kw - PAD)              # flat-index tap offset
            t = kh * KSIZE + kw
            shifted = x if s == 0 else jnp.roll(x, -s, axis=-1)
            taps.append(shifted * m_ref[t])              # (N, cin, HW)

    for co in range(cout):
        acc = jnp.full((N, HW), b_ref[co], dtype=jnp.float32)
        for ci in range(cin):
            base = (co * cin + ci) * (KSIZE * KSIZE)
            for t in range(KSIZE * KSIZE):
                acc = acc + taps[t][:, ci, :] * w_ref[base + t]
        o_ref[:, co, :] = acc.astype(o_ref.dtype)


@jax.jit
def conv2d_3x3_pallas(x, weight, bias):
    """x: (N, Cin, H, W) f32; weight: (Cout, Cin, 3, 3); bias: (Cout,)."""
    N, cin, H, W = x.shape
    cout = weight.shape[0]
    HW = H * W

    x_flat = x.reshape(N, cin, HW).astype(jnp.float32)   # free metadata reshape
    w_flat = weight.reshape(-1).astype(jnp.float32)
    b_flat = bias.astype(jnp.float32)
    masks = _make_tap_masks(H, W)                        # compile-time constant

    kernel = functools.partial(_conv3x3_kernel,
                               N=N, cin=cin, cout=cout, H=H, W=W)

    out_flat = pl.pallas_call(
        kernel,
        out_shape=jax.ShapeDtypeStruct((N, cout, HW), jnp.float32),
        grid_spec=pltpu.PrefetchScalarGridSpec(
            num_scalar_prefetch=0,
            grid=(1,),  # whole batch in a single invocation
            in_specs=[
                pl.BlockSpec(memory_space=pltpu.MemorySpace.SMEM),   # weights
                pl.BlockSpec(memory_space=pltpu.MemorySpace.SMEM),   # bias
                pl.BlockSpec((N, cin, HW), lambda i: (0, 0, 0)),     # x (flat)
                pl.BlockSpec((KSIZE * KSIZE, 1, 1, HW),
                             lambda i: (0, 0, 0, 0)),                # tap masks
            ],
            out_specs=pl.BlockSpec((N, cout, HW), lambda i: (0, 0, 0)),
        ),
        compiler_params=pltpu.CompilerParams(
            dimension_semantics=("arbitrary",)),
    )(w_flat, b_flat, x_flat, masks)

    return out_flat.reshape(N, cout, H, W)               # free metadata reshape


class UNetPallas:
    """Mirror of the PyTorch UNet(in_channels=3, out_channels=1)."""

    def __init__(self, key, in_channels=IN_CHANNELS, out_channels=OUT_CHANNELS):
        kw, kb = jax.random.split(key)
        fan_in = in_channels * KSIZE * KSIZE
        bound = 1.0 / jnp.sqrt(fan_in)
        self.weight = jax.random.uniform(
            kw, (out_channels, in_channels, KSIZE, KSIZE),
            minval=-bound, maxval=bound, dtype=jnp.float32)
        self.bias = jax.random.uniform(
            kb, (out_channels,), minval=-bound, maxval=bound,
            dtype=jnp.float32)

    def __call__(self, x):
        return conv2d_3x3_pallas(x, self.weight, self.bias)


if __name__ == "__main__":
    key = jax.random.PRNGKey(0)
    k_x, k_params = jax.random.split(key)

    # small shapes consistent with the module: batch=2, in_channels=3, 16x16
    x = jax.random.normal(k_x, (2, IN_CHANNELS, 16, 16), dtype=jnp.float32)

    model = UNetPallas(k_params)
    out = jax.block_until_ready(model(x))

    # sanity check against XLA's conv (same semantics as nn.Conv2d, padding=1)
    ref = jax.lax.conv_general_dilated(
        x, model.weight, window_strides=(1, 1), padding=((1, 1), (1, 1)),
        dimension_numbers=("NCHW", "OIHW", "NCHW")) + model.bias[None, :, None, None]
    assert out.shape == (2, OUT_CHANNELS, 16, 16)
    assert jnp.allclose(out, ref, atol=1e-5, rtol=1e-5)

    print("KERNEL_OK")
</pallas_src>

<mosaic_0001>
module attributes {stable_mosaic.version = 11 : i64} {
  func.func @_conv3x3_kernel(%arg0: i32, %arg1: memref<27xf32, #tpu.memory_space<smem>>, %arg2: memref<1xf32, #tpu.memory_space<smem>>, %arg3: memref<2x3x256xf32, #tpu.memory_space<vmem>>, %arg4: memref<9x1x1x256xf32, #tpu.memory_space<vmem>>, %arg5: memref<2x1x256xf32, #tpu.memory_space<vmem>>) attributes {dimension_semantics = [#tpu.dimension_semantics<arbitrary>], iteration_bounds = array<i64: 1>, scalar_prefetch = 0 : i64, scratch_operands = 0 : i64, tpu.core_type = #tpu.core_type<tc>, window_params = [{transform_indices = @transform_0, window_bounds = array<i64: 27>}, {transform_indices = @transform_1, window_bounds = array<i64: 1>}, {pipeline_mode = #tpu.pipeline_mode<synchronous>, transform_indices = @transform_2, window_bounds = array<i64: 2, 3, 256>}, {pipeline_mode = #tpu.pipeline_mode<synchronous>, transform_indices = @transform_3, window_bounds = array<i64: 9, 1, 1, 256>}, {pipeline_mode = #tpu.pipeline_mode<synchronous>, transform_indices = @transform_4, window_bounds = array<i64: 2, 1, 256>}]} {
    %c0 = arith.constant 0 : index
    %c0_0 = arith.constant 0 : index
    %c0_1 = arith.constant 0 : index
    %0 = vector.load %arg3[%c0, %c0_0, %c0_1] : memref<2x3x256xf32, #tpu.memory_space<vmem>>, vector<2x3x256xf32>
    %1 = vector.extract_strided_slice %0 {offsets = [0, 0, 239], sizes = [2, 3, 17], strides = [1, 1, 1]} : vector<2x3x256xf32> to vector<2x3x17xf32>
    %2 = vector.extract_strided_slice %0 {offsets = [0, 0, 0], sizes = [2, 3, 239], strides = [1, 1, 1]} : vector<2x3x256xf32> to vector<2x3x239xf32>
    %3 = tpu.concatenate %1, %2 in 2 : vector<2x3x17xf32>, vector<2x3x239xf32> -> vector<2x3x256xf32>
    %c0_2 = arith.constant 0 : index
    %c0_3 = arith.constant 0 : index
    %c0_4 = arith.constant 0 : index
    %c0_5 = arith.constant 0 : index
    %4 = vector.load %arg4[%c0_2, %c0_3, %c0_4, %c0_5] : memref<9x1x1x256xf32, #tpu.memory_space<vmem>>, vector<1x1x1x256xf32>
    %5 = vector.shape_cast %4 : vector<1x1x1x256xf32> to vector<1x1x256xf32>
    %6 = vector.broadcast %5 : vector<1x1x256xf32> to vector<2x3x256xf32>
    %7 = arith.mulf %3, %6 : vector<2x3x256xf32>
    %8 = vector.extract_strided_slice %0 {offsets = [0, 0, 240], sizes = [2, 3, 16], strides = [1, 1, 1]} : vector<2x3x256xf32> to vector<2x3x16xf32>
    %9 = vector.extract_strided_slice %0 {offsets = [0, 0, 0], sizes = [2, 3, 240], strides = [1, 1, 1]} : vector<2x3x256xf32> to vector<2x3x240xf32>
    %10 = tpu.concatenate %8, %9 in 2 : vector<2x3x16xf32>, vector<2x3x240xf32> -> vector<2x3x256xf32>
    %c1 = arith.constant 1 : index
    %c0_6 = arith.constant 0 : index
    %c0_7 = arith.constant 0 : index
    %c0_8 = arith.constant 0 : index
    %11 = vector.load %arg4[%c1, %c0_6, %c0_7, %c0_8] : memref<9x1x1x256xf32, #tpu.memory_space<vmem>>, vector<1x1x1x256xf32>
    %12 = vector.shape_cast %11 : vector<1x1x1x256xf32> to vector<1x1x256xf32>
    %13 = vector.broadcast %12 : vector<1x1x256xf32> to vector<2x3x256xf32>
    %14 = arith.mulf %10, %13 : vector<2x3x256xf32>
    %15 = vector.extract_strided_slice %0 {offsets = [0, 0, 241], sizes = [2, 3, 15], strides = [1, 1, 1]} : vector<2x3x256xf32> to vector<2x3x15xf32>
    %16 = vector.extract_strided_slice %0 {offsets = [0, 0, 0], sizes = [2, 3, 241], strides = [1, 1, 1]} : vector<2x3x256xf32> to vector<2x3x241xf32>
    %17 = tpu.concatenate %15, %16 in 2 : vector<2x3x15xf32>, vector<2x3x241xf32> -> vector<2x3x256xf32>
    %c2 = arith.constant 2 : index
    %c0_9 = arith.constant 0 : index
    %c0_10 = arith.constant 0 : index
    %c0_11 = arith.constant 0 : index
    %18 = vector.load %arg4[%c2, %c0_9, %c0_10, %c0_11] : memref<9x1x1x256xf32, #tpu.memory_space<vmem>>, vector<1x1x1x256xf32>
    %19 = vector.shape_cast %18 : vector<1x1x1x256xf32> to vector<1x1x256xf32>
    %20 = vector.broadcast %19 : vector<1x1x256xf32> to vector<2x3x256xf32>
    %21 = arith.mulf %17, %20 : vector<2x3x256xf32>
    %22 = vector.extract_strided_slice %0 {offsets = [0, 0, 255], sizes = [2, 3, 1], strides = [1, 1, 1]} : vector<2x3x256xf32> to vector<2x3x1xf32>
    %23 = vector.extract_strided_slice %0 {offsets = [0, 0, 0], sizes = [2, 3, 255], strides = [1, 1, 1]} : vector<2x3x256xf32> to vector<2x3x255xf32>
    %24 = tpu.concatenate %22, %23 in 2 : vector<2x3x1xf32>, vector<2x3x255xf32> -> vector<2x3x256xf32>
    %c3 = arith.constant 3 : index
    %c0_12 = arith.constant 0 : index
    %c0_13 = arith.constant 0 : index
    %c0_14 = arith.constant 0 : index
    %25 = vector.load %arg4[%c3, %c0_12, %c0_13, %c0_14] : memref<9x1x1x256xf32, #tpu.memory_space<vmem>>, vector<1x1x1x256xf32>
    %26 = vector.shape_cast %25 : vector<1x1x1x256xf32> to vector<1x1x256xf32>
    %27 = vector.broadcast %26 : vector<1x1x256xf32> to vector<2x3x256xf32>
    %28 = arith.mulf %24, %27 : vector<2x3x256xf32>
    %c4 = arith.constant 4 : index
    %c0_15 = arith.constant 0 : index
    %c0_16 = arith.constant 0 : index
    %c0_17 = arith.constant 0 : index
    %29 = vector.load %arg4[%c4, %c0_15, %c0_16, %c0_17] : memref<9x1x1x256xf32, #tpu.memory_space<vmem>>, vector<1x1x1x256xf32>
    %30 = vector.shape_cast %29 : vector<1x1x1x256xf32> to vector<1x1x256xf32>
    %31 = vector.broadcast %30 : vector<1x1x256xf32> to vector<2x3x256xf32>
    %32 = arith.mulf %0, %31 : vector<2x3x256xf32>
    %33 = vector.extract_strided_slice %0 {offsets = [0, 0, 1], sizes = [2, 3, 255], strides = [1, 1, 1]} : vector<2x3x256xf32> to vector<2x3x255xf32>
    %34 = vector.extract_strided_slice %0 {offsets = [0, 0, 0], sizes = [2, 3, 1], strides = [1, 1, 1]} : vector<2x3x256xf32> to vector<2x3x1xf32>
    %35 = tpu.concatenate %33, %34 in 2 : vector<2x3x255xf32>, vector<2x3x1xf32> -> vector<2x3x256xf32>
    %c5 = arith.constant 5 : index
    %c0_18 = arith.constant 0 : index
    %c0_19 = arith.constant 0 : index
    %c0_20 = arith.constant 0 : index
    %36 = vector.load %arg4[%c5, %c0_18, %c0_19, %c0_20] : memref<9x1x1x256xf32, #tpu.memory_space<vmem>>, vector<1x1x1x256xf32>
    %37 = vector.shape_cast %36 : vector<1x1x1x256xf32> to vector<1x1x256xf32>
    %38 = vector.broadcast %37 : vector<1x1x256xf32> to vector<2x3x256xf32>
    %39 = arith.mulf %35, %38 : vector<2x3x256xf32>
    %40 = vector.extract_strided_slice %0 {offsets = [0, 0, 15], sizes = [2, 3, 241], strides = [1, 1, 1]} : vector<2x3x256xf32> to vector<2x3x241xf32>
    %41 = vector.extract_strided_slice %0 {offsets = [0, 0, 0], sizes = [2, 3, 15], strides = [1, 1, 1]} : vector<2x3x256xf32> to vector<2x3x15xf32>
    %42 = tpu.concatenate %40, %41 in 2 : vector<2x3x241xf32>, vector<2x3x15xf32> -> vector<2x3x256xf32>
    %c6 = arith.constant 6 : index
    %c0_21 = arith.constant 0 : index
    %c0_22 = arith.constant 0 : index
    %c0_23 = arith.constant 0 : index
    %43 = vector.load %arg4[%c6, %c0_21, %c0_22, %c0_23] : memref<9x1x1x256xf32, #tpu.memory_space<vmem>>, vector<1x1x1x256xf32>
    %44 = vector.shape_cast %43 : vector<1x1x1x256xf32> to vector<1x1x256xf32>
    %45 = vector.broadcast %44 : vector<1x1x256xf32> to vector<2x3x256xf32>
    %46 = arith.mulf %42, %45 : vector<2x3x256xf32>
    %47 = vector.extract_strided_slice %0 {offsets = [0, 0, 16], sizes = [2, 3, 240], strides = [1, 1, 1]} : vector<2x3x256xf32> to vector<2x3x240xf32>
    %48 = vector.extract_strided_slice %0 {offsets = [0, 0, 0], sizes = [2, 3, 16], strides = [1, 1, 1]} : vector<2x3x256xf32> to vector<2x3x16xf32>
    %49 = tpu.concatenate %47, %48 in 2 : vector<2x3x240xf32>, vector<2x3x16xf32> -> vector<2x3x256xf32>
    %c7 = arith.constant 7 : index
    %c0_24 = arith.constant 0 : index
    %c0_25 = arith.constant 0 : index
    %c0_26 = arith.constant 0 : index
    %50 = vector.load %arg4[%c7, %c0_24, %c0_25, %c0_26] : memref<9x1x1x256xf32, #tpu.memory_space<vmem>>, vector<1x1x1x256xf32>
    %51 = vector.shape_cast %50 : vector<1x1x1x256xf32> to vector<1x1x256xf32>
    %52 = vector.broadcast %51 : vector<1x1x256xf32> to vector<2x3x256xf32>
    %53 = arith.mulf %49, %52 : vector<2x3x256xf32>
    %54 = vector.extract_strided_slice %0 {offsets = [0, 0, 17], sizes = [2, 3, 239], strides = [1, 1, 1]} : vector<2x3x256xf32> to vector<2x3x239xf32>
    %55 = vector.extract_strided_slice %0 {offsets = [0, 0, 0], sizes = [2, 3, 17], strides = [1, 1, 1]} : vector<2x3x256xf32> to vector<2x3x17xf32>
    %56 = tpu.concatenate %54, %55 in 2 : vector<2x3x239xf32>, vector<2x3x17xf32> -> vector<2x3x256xf32>
    %c8 = arith.constant 8 : index
    %c0_27 = arith.constant 0 : index
    %c0_28 = arith.constant 0 : index
    %c0_29 = arith.constant 0 : index
    %57 = vector.load %arg4[%c8, %c0_27, %c0_28, %c0_29] : memref<9x1x1x256xf32, #tpu.memory_space<vmem>>, vector<1x1x1x256xf32>
    %58 = vector.shape_cast %57 : vector<1x1x1x256xf32> to vector<1x1x256xf32>
    %59 = vector.broadcast %58 : vector<1x1x256xf32> to vector<2x3x256xf32>
    %60 = arith.mulf %56, %59 : vector<2x3x256xf32>
    %c0_30 = arith.constant 0 : index
    %61 = memref.load %arg2[%c0_30] : memref<1xf32, #tpu.memory_space<smem>>
    %62 = vector.broadcast %61 : f32 to vector<2x256xf32>
    %63 = vector.extract_strided_slice %7 {offsets = [0, 0, 0], sizes = [2, 1, 256], strides = [1, 1, 1]} : vector<2x3x256xf32> to vector<2x1x256xf32>
    %64 = vector.shape_cast %63 : vector<2x1x256xf32> to vector<2x256xf32>
    %c0_31 = arith.constant 0 : index
    %65 = memref.load %arg1[%c0_31] : memref<27xf32, #tpu.memory_space<smem>>
    %66 = vector.broadcast %65 : f32 to vector<2x256xf32>
    %67 = arith.mulf %64, %66 : vector<2x256xf32>
    %68 = arith.addf %62, %67 : vector<2x256xf32>
    %69 = vector.extract_strided_slice %14 {offsets = [0, 0, 0], sizes = [2, 1, 256], strides = [1, 1, 1]} : vector<2x3x256xf32> to vector<2x1x256xf32>
    %70 = vector.shape_cast %69 : vector<2x1x256xf32> to vector<2x256xf32>
    %c1_32 = arith.constant 1 : index
    %71 = memref.load %arg1[%c1_32] : memref<27xf32, #tpu.memory_space<smem>>
    %72 = vector.broadcast %71 : f32 to vector<2x256xf32>
    %73 = arith.mulf %70, %72 : vector<2x256xf32>
    %74 = arith.addf %68, %73 : vector<2x256xf32>
    %75 = vector.extract_strided_slice %21 {offsets = [0, 0, 0], sizes = [2, 1, 256], strides = [1, 1, 1]} : vector<2x3x256xf32> to vector<2x1x256xf32>
    %76 = vector.shape_cast %75 : vector<2x1x256xf32> to vector<2x256xf32>
    %c2_33 = arith.constant 2 : index
    %77 = memref.load %arg1[%c2_33] : memref<27xf32, #tpu.memory_space<smem>>
    %78 = vector.broadcast %77 : f32 to vector<2x256xf32>
    %79 = arith.mulf %76, %78 : vector<2x256xf32>
    %80 = arith.addf %74, %79 : vector<2x256xf32>
    %81 = vector.extract_strided_slice %28 {offsets = [0, 0, 0], sizes = [2, 1, 256], strides = [1, 1, 1]} : vector<2x3x256xf32> to vector<2x1x256xf32>
    %82 = vector.shape_cast %81 : vector<2x1x256xf32> to vector<2x256xf32>
    %c3_34 = arith.constant 3 : index
    %83 = memref.load %arg1[%c3_34] : memref<27xf32, #tpu.memory_space<smem>>
    %84 = vector.broadcast %83 : f32 to vector<2x256xf32>
    %85 = arith.mulf %82, %84 : vector<2x256xf32>
    %86 = arith.addf %80, %85 : vector<2x256xf32>
    %87 = vector.extract_strided_slice %32 {offsets = [0, 0, 0], sizes = [2, 1, 256], strides = [1, 1, 1]} : vector<2x3x256xf32> to vector<2x1x256xf32>
    %88 = vector.shape_cast %87 : vector<2x1x256xf32> to vector<2x256xf32>
    %c4_35 = arith.constant 4 : index
    %89 = memref.load %arg1[%c4_35] : memref<27xf32, #tpu.memory_space<smem>>
    %90 = vector.broadcast %89 : f32 to vector<2x256xf32>
    %91 = arith.mulf %88, %90 : vector<2x256xf32>
    %92 = arith.addf %86, %91 : vector<2x256xf32>
    %93 = vector.extract_strided_slice %39 {offsets = [0, 0, 0], sizes = [2, 1, 256], strides = [1, 1, 1]} : vector<2x3x256xf32> to vector<2x1x256xf32>
    %94 = vector.shape_cast %93 : vector<2x1x256xf32> to vector<2x256xf32>
    %c5_36 = arith.constant 5 : index
    %95 = memref.load %arg1[%c5_36] : memref<27xf32, #tpu.memory_space<smem>>
    %96 = vector.broadcast %95 : f32 to vector<2x256xf32>
    %97 = arith.mulf %94, %96 : vector<2x256xf32>
    %98 = arith.addf %92, %97 : vector<2x256xf32>
    %99 = vector.extract_strided_slice %46 {offsets = [0, 0, 0], sizes = [2, 1, 256], strides = [1, 1, 1]} : vector<2x3x256xf32> to vector<2x1x256xf32>
    %100 = vector.shape_cast %99 : vector<2x1x256xf32> to vector<2x256xf32>
    %c6_37 = arith.constant 6 : index
    %101 = memref.load %arg1[%c6_37] : memref<27xf32, #tpu.memory_space<smem>>
    %102 = vector.broadcast %101 : f32 to vector<2x256xf32>
    %103 = arith.mulf %100, %102 : vector<2x256xf32>
    %104 = arith.addf %98, %103 : vector<2x256xf32>
    %105 = vector.extract_strided_slice %53 {offsets = [0, 0, 0], sizes = [2, 1, 256], strides = [1, 1, 1]} : vector<2x3x256xf32> to vector<2x1x256xf32>
    %106 = vector.shape_cast %105 : vector<2x1x256xf32> to vector<2x256xf32>
    %c7_38 = arith.constant 7 : index
    %107 = memref.load %arg1[%c7_38] : memref<27xf32, #tpu.memory_space<smem>>
    %108 = vector.broadcast %107 : f32 to vector<2x256xf32>
    %109 = arith.mulf %106, %108 : vector<2x256xf32>
    %110 = arith.addf %104, %109 : vector<2x256xf32>
    %111 = vector.extract_strided_slice %60 {offsets = [0, 0, 0], sizes = [2, 1, 256], strides = [1, 1, 1]} : vector<2x3x256xf32> to vector<2x1x256xf32>
    %112 = vector.shape_cast %111 : vector<2x1x256xf32> to vector<2x256xf32>
    %c8_39 = arith.constant 8 : index
    %113 = memref.load %arg1[%c8_39] : memref<27xf32, #tpu.memory_space<smem>>
    %114 = vector.broadcast %113 : f32 to vector<2x256xf32>
    %115 = arith.mulf %112, %114 : vector<2x256xf32>
    %116 = arith.addf %110, %115 : vector<2x256xf32>
    %117 = vector.extract_strided_slice %7 {offsets = [0, 1, 0], sizes = [2, 1, 256], strides = [1, 1, 1]} : vector<2x3x256xf32> to vector<2x1x256xf32>
    %118 = vector.shape_cast %117 : vector<2x1x256xf32> to vector<2x256xf32>
    %c9 = arith.constant 9 : index
    %119 = memref.load %arg1[%c9] : memref<27xf32, #tpu.memory_space<smem>>
    %120 = vector.broadcast %119 : f32 to vector<2x256xf32>
    %121 = arith.mulf %118, %120 : vector<2x256xf32>
    %122 = arith.addf %116, %121 : vector<2x256xf32>
    %123 = vector.extract_strided_slice %14 {offsets = [0, 1, 0], sizes = [2, 1, 256], strides = [1, 1, 1]} : vector<2x3x256xf32> to vector<2x1x256xf32>
    %124 = vector.shape_cast %123 : vector<2x1x256xf32> to vector<2x256xf32>
    %c10 = arith.constant 10 : index
    %125 = memref.load %arg1[%c10] : memref<27xf32, #tpu.memory_space<smem>>
    %126 = vector.broadcast %125 : f32 to vector<2x256xf32>
    %127 = arith.mulf %124, %126 : vector<2x256xf32>
    %128 = arith.addf %122, %127 : vector<2x256xf32>
    %129 = vector.extract_strided_slice %21 {offsets = [0, 1, 0], sizes = [2, 1, 256], strides = [1, 1, 1]} : vector<2x3x256xf32> to vector<2x1x256xf32>
    %130 = vector.shape_cast %129 : vector<2x1x256xf32> to vector<2x256xf32>
    %c11 = arith.constant 11 : index
    %131 = memref.load %arg1[%c11] : memref<27xf32, #tpu.memory_space<smem>>
    %132 = vector.broadcast %131 : f32 to vector<2x256xf32>
    %133 = arith.mulf %130, %132 : vector<2x256xf32>
    %134 = arith.addf %128, %133 : vector<2x256xf32>
    %135 = vector.extract_strided_slice %28 {offsets = [0, 1, 0], sizes = [2, 1, 256], strides = [1, 1, 1]} : vector<2x3x256xf32> to vector<2x1x256xf32>
    %136 = vector.shape_cast %135 : vector<2x1x256xf32> to vector<2x256xf32>
    %c12 = arith.constant 12 : index
    %137 = memref.load %arg1[%c12] : memref<27xf32, #tpu.memory_space<smem>>
    %138 = vector.broadcast %137 : f32 to vector<2x256xf32>
    %139 = arith.mulf %136, %138 : vector<2x256xf32>
    %140 = arith.addf %134, %139 : vector<2x256xf32>
    %141 = vector.extract_strided_slice %32 {offsets = [0, 1, 0], sizes = [2, 1, 256], strides = [1, 1, 1]} : vector<2x3x256xf32> to vector<2x1x256xf32>
    %142 = vector.shape_cast %141 : vector<2x1x256xf32> to vector<2x256xf32>
    %c13 = arith.constant 13 : index
    %143 = memref.load %arg1[%c13] : memref<27xf32, #tpu.memory_space<smem>>
    %144 = vector.broadcast %143 : f32 to vector<2x256xf32>
    %145 = arith.mulf %142, %144 : vector<2x256xf32>
    %146 = arith.addf %140, %145 : vector<2x256xf32>
    %147 = vector.extract_strided_slice %39 {offsets = [0, 1, 0], sizes = [2, 1, 256], strides = [1, 1, 1]} : vector<2x3x256xf32> to vector<2x1x256xf32>
    %148 = vector.shape_cast %147 : vector<2x1x256xf32> to vector<2x256xf32>
    %c14 = arith.constant 14 : index
    %149 = memref.load %arg1[%c14] : memref<27xf32, #tpu.memory_space<smem>>
    %150 = vector.broadcast %149 : f32 to vector<2x256xf32>
    %151 = arith.mulf %148, %150 : vector<2x256xf32>
    %152 = arith.addf %146, %151 : vector<2x256xf32>
    %153 = vector.extract_strided_slice %46 {offsets = [0, 1, 0], sizes = [2, 1, 256], strides = [1, 1, 1]} : vector<2x3x256xf32> to vector<2x1x256xf32>
    %154 = vector.shape_cast %153 : vector<2x1x256xf32> to vector<2x256xf32>
    %c15 = arith.constant 15 : index
    %155 = memref.load %arg1[%c15] : memref<27xf32, #tpu.memory_space<smem>>
    %156 = vector.broadcast %155 : f32 to vector<2x256xf32>
    %157 = arith.mulf %154, %156 : vector<2x256xf32>
    %158 = arith.addf %152, %157 : vector<2x256xf32>
    %159 = vector.extract_strided_slice %53 {offsets = [0, 1, 0], sizes = [2, 1, 256], strides = [1, 1, 1]} : vector<2x3x256xf32> to vector<2x1x256xf32>
    %160 = vector.shape_cast %159 : vector<2x1x256xf32> to vector<2x256xf32>
    %c16 = arith.constant 16 : index
    %161 = memref.load %arg1[%c16] : memref<27xf32, #tpu.memory_space<smem>>
    %162 = vector.broadcast %161 : f32 to vector<2x256xf32>
    %163 = arith.mulf %160, %162 : vector<2x256xf32>
    %164 = arith.addf %158, %163 : vector<2x256xf32>
    %165 = vector.extract_strided_slice %60 {offsets = [0, 1, 0], sizes = [2, 1, 256], strides = [1, 1, 1]} : vector<2x3x256xf32> to vector<2x1x256xf32>
    %166 = vector.shape_cast %165 : vector<2x1x256xf32> to vector<2x256xf32>
    %c17 = arith.constant 17 : index
    %167 = memref.load %arg1[%c17] : memref<27xf32, #tpu.memory_space<smem>>
    %168 = vector.broadcast %167 : f32 to vector<2x256xf32>
    %169 = arith.mulf %166, %168 : vector<2x256xf32>
    %170 = arith.addf %164, %169 : vector<2x256xf32>
    %171 = vector.extract_strided_slice %7 {offsets = [0, 2, 0], sizes = [2, 1, 256], strides = [1, 1, 1]} : vector<2x3x256xf32> to vector<2x1x256xf32>
    %172 = vector.shape_cast %171 : vector<2x1x256xf32> to vector<2x256xf32>
    %c18 = arith.constant 18 : index
    %173 = memref.load %arg1[%c18] : memref<27xf32, #tpu.memory_space<smem>>
    %174 = vector.broadcast %173 : f32 to vector<2x256xf32>
    %175 = arith.mulf %172, %174 : vector<2x256xf32>
    %176 = arith.addf %170, %175 : vector<2x256xf32>
    %177 = vector.extract_strided_slice %14 {offsets = [0, 2, 0], sizes = [2, 1, 256], strides = [1, 1, 1]} : vector<2x3x256xf32> to vector<2x1x256xf32>
    %178 = vector.shape_cast %177 : vector<2x1x256xf32> to vector<2x256xf32>
    %c19 = arith.constant 19 : index
    %179 = memref.load %arg1[%c19] : memref<27xf32, #tpu.memory_space<smem>>
    %180 = vector.broadcast %179 : f32 to vector<2x256xf32>
    %181 = arith.mulf %178, %180 : vector<2x256xf32>
    %182 = arith.addf %176, %181 : vector<2x256xf32>
    %183 = vector.extract_strided_slice %21 {offsets = [0, 2, 0], sizes = [2, 1, 256], strides = [1, 1, 1]} : vector<2x3x256xf32> to vector<2x1x256xf32>
    %184 = vector.shape_cast %183 : vector<2x1x256xf32> to vector<2x256xf32>
    %c20 = arith.constant 20 : index
    %185 = memref.load %arg1[%c20] : memref<27xf32, #tpu.memory_space<smem>>
    %186 = vector.broadcast %185 : f32 to vector<2x256xf32>
    %187 = arith.mulf %184, %186 : vector<2x256xf32>
    %188 = arith.addf %182, %187 : vector<2x256xf32>
    %189 = vector.extract_strided_slice %28 {offsets = [0, 2, 0], sizes = [2, 1, 256], strides = [1, 1, 1]} : vector<2x3x256xf32> to vector<2x1x256xf32>
    %190 = vector.shape_cast %189 : vector<2x1x256xf32> to vector<2x256xf32>
    %c21 = arith.constant 21 : index
    %191 = memref.load %arg1[%c21] : memref<27xf32, #tpu.memory_space<smem>>
    %192 = vector.broadcast %191 : f32 to vector<2x256xf32>
    %193 = arith.mulf %190, %192 : vector<2x256xf32>
    %194 = arith.addf %188, %193 : vector<2x256xf32>
    %195 = vector.extract_strided_slice %32 {offsets = [0, 2, 0], sizes = [2, 1, 256], strides = [1, 1, 1]} : vector<2x3x256xf32> to vector<2x1x256xf32>
    %196 = vector.shape_cast %195 : vector<2x1x256xf32> to vector<2x256xf32>
    %c22 = arith.constant 22 : index
    %197 = memref.load %arg1[%c22] : memref<27xf32, #tpu.memory_space<smem>>
    %198 = vector.broadcast %197 : f32 to vector<2x256xf32>
    %199 = arith.mulf %196, %198 : vector<2x256xf32>
    %200 = arith.addf %194, %199 : vector<2x256xf32>
    %201 = vector.extract_strided_slice %39 {offsets = [0, 2, 0], sizes = [2, 1, 256], strides = [1, 1, 1]} : vector<2x3x256xf32> to vector<2x1x256xf32>
    %202 = vector.shape_cast %201 : vector<2x1x256xf32> to vector<2x256xf32>
    %c23 = arith.constant 23 : index
    %203 = memref.load %arg1[%c23] : memref<27xf32, #tpu.memory_space<smem>>
    %204 = vector.broadcast %203 : f32 to vector<2x256xf32>
    %205 = arith.mulf %202, %204 : vector<2x256xf32>
    %206 = arith.addf %200, %205 : vector<2x256xf32>
    %207 = vector.extract_strided_slice %46 {offsets = [0, 2, 0], sizes = [2, 1, 256], strides = [1, 1, 1]} : vector<2x3x256xf32> to vector<2x1x256xf32>
    %208 = vector.shape_cast %207 : vector<2x1x256xf32> to vector<2x256xf32>
    %c24 = arith.constant 24 : index
    %209 = memref.load %arg1[%c24] : memref<27xf32, #tpu.memory_space<smem>>
    %210 = vector.broadcast %209 : f32 to vector<2x256xf32>
    %211 = arith.mulf %208, %210 : vector<2x256xf32>
    %212 = arith.addf %206, %211 : vector<2x256xf32>
    %213 = vector.extract_strided_slice %53 {offsets = [0, 2, 0], sizes = [2, 1, 256], strides = [1, 1, 1]} : vector<2x3x256xf32> to vector<2x1x256xf32>
    %214 = vector.shape_cast %213 : vector<2x1x256xf32> to vector<2x256xf32>
    %c25 = arith.constant 25 : index
    %215 = memref.load %arg1[%c25] : memref<27xf32, #tpu.memory_space<smem>>
    %216 = vector.broadcast %215 : f32 to vector<2x256xf32>
    %217 = arith.mulf %214, %216 : vector<2x256xf32>
    %218 = arith.addf %212, %217 : vector<2x256xf32>
    %219 = vector.extract_strided_slice %60 {offsets = [0, 2, 0], sizes = [2, 1, 256], strides = [1, 1, 1]} : vector<2x3x256xf32> to vector<2x1x256xf32>
    %220 = vector.shape_cast %219 : vector<2x1x256xf32> to vector<2x256xf32>
    %c26 = arith.constant 26 : index
    %221 = memref.load %arg1[%c26] : memref<27xf32, #tpu.memory_space<smem>>
    %222 = vector.broadcast %221 : f32 to vector<2x256xf32>
    %223 = arith.mulf %220, %222 : vector<2x256xf32>
    %224 = arith.addf %218, %223 : vector<2x256xf32>
    %c0_40 = arith.constant 0 : index
    %c0_41 = arith.constant 0 : index
    %c0_42 = arith.constant 0 : index
    %225 = vector.load %arg5[%c0_40, %c0_41, %c0_42] : memref<2x1x256xf32, #tpu.memory_space<vmem>>, vector<2x1x256xf32>
    %226 = vector.shape_cast %225 : vector<2x1x256xf32> to vector<2x256xf32>
    %227 = vector.shape_cast %224 : vector<2x256xf32> to vector<2x1x256xf32>
    tpu.vector_store %arg5[%c0_40, %c0_41, %c0_42], %227 {strides = array<i32>} : memref<2x1x256xf32, #tpu.memory_space<vmem>>, vector<2x1x256xf32>,
    return
  }
  func.func @transform_0(%arg0: i32) -> i32 {
    %c0_i32 = arith.constant 0 : i32
    %c0_i32_0 = arith.constant 0 : i32
    return %c0_i32 : i32
  }
  func.func @transform_1(%arg0: i32) -> i32 {
    %c0_i32 = arith.constant 0 : i32
    %c0_i32_0 = arith.constant 0 : i32
    return %c0_i32 : i32
  }
  func.func @transform_2(%arg0: i32) -> (i32, i32, i32) {
    %c0_i32 = arith.constant 0 : i32
    %c0_i32_0 = arith.constant 0 : i32
    %c0_i32_1 = arith.constant 0 : i32
    %c0_i32_2 = arith.constant 0 : i32
    return %c0_i32, %c0_i32_0, %c0_i32_1 : i32, i32, i32
  }
  func.func @transform_3(%arg0: i32) -> (i32, i32, i32, i32) {
    %c0_i32 = arith.constant 0 : i32
    %c0_i32_0 = arith.constant 0 : i32
    %c0_i32_1 = arith.constant 0 : i32
    %c0_i32_2 = arith.constant 0 : i32
    %c0_i32_3 = arith.constant 0 : i32
    return %c0_i32, %c0_i32_0, %c0_i32_1, %c0_i32_2 : i32, i32, i32, i32
  }
  func.func @transform_4(%arg0: i32) -> (i32, i32, i32) {
    %c0_i32 = arith.constant 0 : i32
    %c0_i32_0 = arith.constant 0 : i32
    %c0_i32_1 = arith.constant 0 : i32
    %c0_i32_2 = arith.constant 0 : i32
    return %c0_i32, %c0_i32_0, %c0_i32_1 : i32, i32, i32
  }
}

</mosaic_0001>

<bundles_post_ra>
// kernel: conv2d_3x3_pallas.1
= control target key start
LH: loop header
LB: loop body
LE: loop exit
PB: predicated region body
PF: predicated region fallthrough
CT: control target
= control target key end

     0   :  { %10 = vsyncpa [#allocation4], 0  ;;  %s1829_s0 = inlined_call_operand.vmem [shape: f32[27], index: 0, kind: input, shape index: {}]   ;;  %s1830_s1 = inlined_call_operand.<no memory space> [shape: f32[1], index: 1, kind: input, shape index: {}]   ;;  %s1831_s2 = inlined_call_operand.vmem [shape: f32[2,3,256], index: 2, kind: input, shape index: {}]   ;;  %s1832_s3 = inlined_call_operand.vmem [shape: f32[9,1,1,256], index: 3, kind: input, shape index: {}]   ;;  %s1833_s4 = inlined_call_operand.vmem [shape: f32[2,1,256], index: 4, kind: output, shape index: {}]  }
   0x1   :  { %s17_s17 = sshll.u32 %s1829_s0, 4  ;;  %s18_s17 = int_to_ptr.vmem [resolvable:$true] %s17_s17 }
   0x2   :  { %s956_s18 = scalar_lea.vmem %s18_s17, 16  ;;  %p961_p1 = scmp.lt.s32.totalorder %s18_s17, %s18_s17 }
   0x3   :  { %p957_p0 = scmp.ne.s32.totalorder %s18_s17, %s956_s18  ;;  %p962_p2 = scmp.lt.s32.totalorder %s956_s18, %s956_s18 }
   0x5   :  { %p963_p3 = por %p962_p2, %p961_p1 }
   0x7   :  { %p964_p4 = pnand %p963_p3, %p957_p0 }
   0x9   :  { %967 = shalt.err (!%p964_p4)
}
   0xa   :  { %s970_s19 = smov [#allocation3]  }
   0xb   :  { %20 = dma.vmem_to_smem %s18_s17, 16, %s970_s19, [#allocation4]  }
   0xc   :  { %968 = dma.done.wait [#allocation4], 16  }
   0xd   :  { %969 = vsyncadd [#allocation4], 4294967280 }
   0xe   :  { %30 = sfence }
   0xf   :  { %v1011_v0 = vld [vmem:[%s1831_s2] sm:$0x77]  ;;  %v1016_v1 = vld [vmem:[%s1831_s2 + $0x8] sm:$0x77]  ;;  %s971_s23 = smov 17   ;;  %s972_s24 = smov 16   ;;  %v1834_v4 = vlaneseq  ;;  %v1113_v20 = vstv %s1830_s1 }
  0x10   :  { %43 = vrot.lane.b32.xlu1 %v1011_v0, %s971_s23  ;;  %v35_v2 = vcombine.high %v1011_v0, %v1011_v0  ;;  %v36_v3 = vcombine.high %v1016_v1, %v1016_v1  ;;  %s973_s2 = smov 15   ;;  %s974_s25 = smov 1   ;;  %v913_v6 = vld [vmem:[%s1832_s3 + $0x8] sm:$0x3]  ;;  %v56_v15 = vld [vmem:[%s1832_s3] sm:$0x3] }
  0x11   :  { %s975_s26 = smov 127   ;;  %s976_s27 = smov 113   ;;  %v1049_v5 = vshrl.u32 %v1834_v4, 7  ;;  %v910_v16 = vld [vmem:[%s1832_s3 + $0x2] sm:$0x3]  ;;  %vm47_vm0 = vcmask 138240  }
  0x12   :  { %37 = vrot.lane.b32.xlu0 %v35_v2, %s971_s23  ;;  %s977_s28 = smov 112   ;;  %s978_s29 = smov 111   ;;  %v911_v18 = vld [vmem:[%s1832_s3 + $0x4] sm:$0x3]  ;;  %v912_v31 = vld [vmem:[%s1832_s3 + $0x6] sm:$0x3] }
  0x13   :  { %s1038_s30 = sld [smem:[#allocation3]]  ;;  %1863 = vst [vmem:[#allocation6_spill] sm:$0xff] %v1049_v5  ;;  %v1063_v7 = vsub.s32 0, %v1049_v5  ;;  %v1066_v8 = vsub.s32 1, %v1049_v5  ;;  %v914_v39 = vld [vmem:[%s1832_s3 + $0xa] sm:$0x3] }
  0x14   :  { %45 = vrot.lane.b32.xlu1 %v1016_v1, %s971_s23  ;;  %s1040_s5 = sld [smem:[#allocation3 + $0x9]]  ;;  %v393_v40 = vsub.s32 4, %v1049_v5  ;;  %v915_v51 = vld [vmem:[%s1832_s3 + $0xc] sm:$0x3]  ;;  %v916_v61 = vld [vmem:[%s1832_s3 + $0xe] sm:$0x3] }
  0x15   :  { %s1042_s6 = sld [smem:[#allocation3 + $0x12]]  ;;  %1864 = vst [vmem:[#allocation7_spill] sm:$0xff] %v1066_v8  ;;  %v186_v9 = vrot.slane %v913_v6, %v1063_v7  ;;  %v190_v10 = vrot.slane %v913_v6, %v1066_v8  ;;  %v1121_v22 = vrot.slane %v56_v15, %v1063_v7  ;;  %v1124_v23 = vrot.slane %v56_v15, %v1066_v8 }
  0x16   :  { %39 = vrot.lane.b32.xlu0 %v36_v3, %s971_s23  ;;  %s1044_s7 = sld [smem:[#allocation3 + $0x1]]  ;;  %v1129_v25 = vrot.slane %v910_v16, %v1063_v7  ;;  %v1138_v28 = vrot.slane %v910_v16, %v1066_v8  ;;  %v1141_v29 = vrot.slane %v911_v18, %v1063_v7  ;;  %v1144_v30 = vrot.slane %v911_v18, %v1066_v8 }
  0x17   :  { %s1046_s8 = sld [smem:[#allocation3 + $0xa]]  ;;  %v191_v13 = vcombine.low %v186_v9, %v190_v10  ;;  %v1194_v46 = vrot.slane %v912_v31, %v1063_v7  ;;  %v1197_v47 = vrot.slane %v912_v31, %v1066_v8  ;;  %v1214_v53 = vrot.slane %v914_v39, %v1063_v7  ;;  %v917_v9 = vld [vmem:[%s1832_s3 + $0x10] sm:$0x3] }
  0x18   :  { %74 = vrot.lane.b32.xlu1 %v36_v3, %s972_s24  ;;  %s1051_s9 = sld [smem:[#allocation3 + $0x13]]  ;;  %v1217_v54 = vrot.slane %v914_v39, %v1066_v8  ;;  %vm82_vm1 = vcmask 130048   ;;  %v1271_v15 = vrot.slane %v916_v61, %v1063_v7  ;;  %v1274_v16 = vrot.slane %v916_v61, %v1066_v8 }
  0x19   :  { %s1053_s10 = sld [smem:[#allocation3 + $0x2]]  ;;  %v1106_v19 = vmul.f32 %v191_v13, %v1011_v0  ;;  %v1116_v21 = vmul.f32 %v191_v13, %v1016_v1  ;;  %v1135_v27 = vstv %s1038_s30  ;;  %v1295_v61 = vrot.slane %v917_v9, %v1063_v7 }
  0x1a   :  { %72 = vrot.lane.b32.xlu0 %v35_v2, %s972_s24  ;;  %s1055_s11 = sld [smem:[#allocation3 + $0xb]]  ;;  %v1152_v32 = vstv %s1040_s5  ;;  %v551_v55 = vsub.s32 5, %v1049_v5  ;;  %vm118_vm2 = vcmask 121856   ;;  %vm154_vm3 = vcmask 7168  }
  0x1b   :  { %s1057_s12 = sld [smem:[#allocation3 + $0x14]]  ;;  %v1155_v33 = vstv %s1042_s6  ;;  %1874 = vst [vmem:[#allocation17_spill] sm:$0xff] %v1295_v61  ;;  %vm203_vm4 = vcmask 1039360   ;;  %vm239_vm5 = vcmask 924672   ;;  %vm275_vm6 = vcmask 916480  }
  0x1c   :  { %80 = vrot.lane.b32.xlu1 %v1016_v1, %s972_s24  ;;  %s1068_s15 = sld [smem:[#allocation3 + $0x3]]  ;;  %v1160_v35 = vstv %s1044_s7  ;;  %vm311_vm7 = vcmask 908288  }
  0x1d   :  { %s1070_s16 = sld [smem:[#allocation3 + $0xc]]  ;;  %v1168_v37 = vstv %s1046_s8 }
  0x1e   :  { %78 = vrot.lane.b32.xlu0 %v1011_v0, %s972_s24  ;;  %s1072_s17 = sld [smem:[#allocation3 + $0x15]]  ;;  %v1171_v38 = vstv %s1051_s9 }
  0x1f   :  { %s1078_s18 = sld [smem:[#allocation3 + $0x4]]  ;;  %v1185_v43 = vstv %s1053_s10 }
  0x20   :  { %110 = vrot.lane.b32.xlu1 %v36_v3, %s973_s2  ;;  %s1080_s19 = sld [smem:[#allocation3 + $0x5]]  ;;  %v1188_v44 = vstv %s1055_s11 }
  0x21   :  { %s1084_s20 = sld [smem:[#allocation3 + $0xe]]  ;;  %v1191_v45 = vstv %s1057_s12 }
  0x22   :  { %108 = vrot.lane.b32.xlu0 %v35_v2, %s973_s2  ;;  %s1086_s21 = sld [smem:[#allocation3 + $0x17]]  ;;  %v1200_v48 = vstv %s1068_s15 }
  0x23   :  { %s1090_s22 = sld [smem:[#allocation3 + $0x6]]  ;;  %v1203_v49 = vstv %s1070_s16 }
  0x24   :  { %116 = vrot.lane.b32.xlu1 %v1016_v1, %s973_s2  ;;  %s1118_s14 = sld [smem:[#allocation3 + $0x7]]  ;;  %v1206_v50 = vstv %s1072_s17 }
  0x25   :  { %v382_v26 = vstv %s1078_s18  ;;  %s1132_s1 = sld [smem:[#allocation3 + $0x10]] }
  0x26   :  { %114 = vrot.lane.b32.xlu0 %v1011_v0, %s973_s2  ;;  %s1149_s18 = sld [smem:[#allocation3 + $0xd]]  ;;  %v1163_v36 = vmul.f32 %v382_v26, %v1106_v19  ;;  %v1178_v41 = vmul.f32 %v382_v26, %v1116_v21  ;;  %v1227_v57 = vstv %s1080_s19 }
  0x27   :  { %s1165_s30 = sld [smem:[#allocation3 + $0x16]]  ;;  %v1230_v58 = vstv %s1084_s20 }
  0x28   :  { %146 = vrot.lane.b32.xlu1 %v36_v3, %s974_s25  ;;  %s1180_s6 = sld [smem:[#allocation3 + $0x19]]  ;;  %v1222_v56 = vrot.slane %v1163_v36, %v393_v40  ;;  %1865 = vst [vmem:[#allocation8_spill] sm:$0xff] %v1230_v58  ;;  %v1235_v60 = vrot.slane %v1178_v41, %v393_v40  ;;  %v1245_v63 = vstv %s1086_s21 }
  0x29   :  { %s1224_s9 = sld [smem:[#allocation3 + $0x8]]  ;;  %1867 = vst [vmem:[#allocation10_spill] sm:$0xff] %v1245_v63 }
  0x2a   :  { %144 = vrot.lane.b32.xlu0 %v35_v2, %s974_s25  ;;  %1866 = vst [vmem:[#allocation9_spill] sm:$0xff] %v1235_v60  ;;  %s1240_s12 = sld [smem:[#allocation3 + $0x11]]  ;;  %v1277_v18 = vstv %s1118_s14 }
  0x2b   :  { %s1256_s15 = sld [smem:[#allocation3 + $0x1a]]  ;;  %1871 = vst [vmem:[#allocation14_spill] sm:$0xff] %v1277_v18  ;;  %v1287_v40 = vstv %s1132_s1  ;;  %v1320_v18 = vrot.slane %v917_v9, %v1066_v8 }
  0x2c   :  { %152 = vrot.lane.b32.xlu1 %v1016_v1, %s974_s25  ;;  %v540_v10 = vstv %s1149_s18  ;;  %1872 = vst [vmem:[#allocation15_spill] sm:$0xff] %v1287_v40 }
  0x2d   :  { %v746_v26 = vstv %s1165_s30  ;;  %v1298_v59 = vmul.f32 %v540_v10, %v1106_v19  ;;  %v1307_v40 = vmul.f32 %v540_v10, %v1116_v21  ;;  %1877 = vst [vmem:[#allocation20_spill] sm:$0xff] %v1320_v18 }
  0x2e   :  { %150 = vrot.lane.b32.xlu0 %v1011_v0, %s974_s25  ;;  %s1098_s25 = sld [smem:[#allocation3 + $0xf]] }
  0x2f   :  { %1876 = vst [vmem:[#allocation19_spill] sm:$0xff] %v1307_v40  ;;  %v1334_v60 = vrot.slane %v1298_v59, %v551_v55 }
  0x30   :  { %197 = vrot.lane.b32.xlu1 %v35_v2, %s975_s26  ;;  %v1326_v10 = vstv %s1240_s12 }
  0x31   :  { %1879 = vst [vmem:[#allocation22_spill] sm:$0xff] %v1326_v10  ;;  %1880 = vst [vmem:[#allocation23_spill] sm:$0xff] %v1334_v60 }
  0x32   :  { %195 = vrot.lane.b32.xlu0 %v1011_v0, %s975_s26 }
  0x34   :  { %201 = vrot.lane.b32.xlu1 %v36_v3, %s975_s26 }
  0x36   :  { %199 = vrot.lane.b32.xlu0 %v1016_v1, %s975_s26 }
  0x38   :  { %233 = vrot.lane.b32.xlu1 %v35_v2, %s976_s27 }
  0x3a   :  { %231 = vrot.lane.b32.xlu0 %v1011_v0, %s976_s27 }
  0x3c   :  { %237 = vrot.lane.b32.xlu1 %v36_v3, %s976_s27 }
  0x3e   :  { %235 = vrot.lane.b32.xlu0 %v1016_v1, %s976_s27 }
  0x40   :  { %269 = vrot.lane.b32.xlu1 %v35_v2, %s977_s28 }
  0x42   :  { %267 = vrot.lane.b32.xlu0 %v1011_v0, %s977_s28 }
  0x44   :  { %273 = vrot.lane.b32.xlu1 %v36_v3, %s977_s28 }
  0x46   :  { %271 = vrot.lane.b32.xlu0 %v1016_v1, %s977_s28  ;;  %s1108_s28 = sld [smem:[#allocation3 + $0x18]] }
  0x48   :  { %305 = vrot.lane.b32.xlu1 %v35_v2, %s978_s29  ;;  %v1254_v2 = vstv %s1090_s22 }
  0x49   :  { %1868 = vst [vmem:[#allocation11_spill] sm:$0xff] %v1254_v2 }
  0x4a   :  { %303 = vrot.lane.b32.xlu0 %v1011_v0, %s978_s29  ;;  %v1248_v0 = vrot.slane %v915_v51, %v1063_v7 }
  0x4c   :  { %309 = vrot.lane.b32.xlu1 %v36_v3, %s978_s29  ;;  %v1259_v3 = vstv %s1098_s25  ;;  %v1262_v6 = vstv %s1108_s28 }
  0x4d   :  { %1869 = vst [vmem:[#allocation12_spill] sm:$0xff] %v1259_v3  ;;  %1870 = vst [vmem:[#allocation13_spill] sm:$0xff] %v1262_v6  ;;  %v979_v6 = vmov 1966171168  }
  0x4e   :  { %307 = vrot.lane.b32.xlu0 %v1016_v1, %s978_s29  ;;  %v1251_v1 = vrot.slane %v915_v51, %v1066_v8  ;;  %v1290_v51 = vstv %s1180_s6  ;;  %v1301_v63 = vunpack.c.l.s4 %v979_v6 }
  0x4f   :  { %1873 = vst [vmem:[#allocation16_spill] sm:$0xff] %v1290_v51  ;;  %v757_v51 = vsub.s32 6, %v1049_v5 }
  0x50   :  { %1875 = vst [vmem:[#allocation18_spill] sm:$0xff] %v1301_v63 }
  0x82   :  { %v1076_v11 = vpop.permute.xlu1 %43 }
  0x84   :  { %v1082_v12 = vpop.permute.xlu0 %37 }
  0x85   :  { %v48_v31 = vsel %vm47_vm0, %v1076_v11, %v1082_v12  ;;  %v54_v39 = vsel %vm47_vm0, %v1082_v12, %v1076_v11  ;;  %v747_v11 = vmul.f32 %v746_v26, %v1106_v19  ;;  %v753_v12 = vsub.s32 2, %v1049_v5 }
  0x86   :  { %v1088_v14 = vpop.permute.xlu1 %45  ;;  %v68_v3 = vmul.f32 %v1121_v22, %v54_v39  ;;  %v69_v58 = vmul.f32 %v1124_v23, %v48_v31  ;;  %v1323_v5 = vstv %s1224_s9  ;;  %v748_v39 = vmul.f32 %v746_v26, %v1116_v21 }
  0x87   :  { %1878 = vst [vmem:[#allocation21_spill] sm:$0xff] %v1323_v5  ;;  %v1342_v18 = vrot.slane %v747_v11, %v753_v12  ;;  %v1344_v10 = vrot.slane %v747_v11, %v757_v51 }
  0x88   :  { %v1100_v17 = vpop.permute.xlu0 %39  ;;  %v343_v21 = vmul.f32 %v1135_v27, %v68_v3  ;;  %v344_v26 = vmul.f32 %v1135_v27, %v69_v58  ;;  %v1363_v11 = vrot.slane %v748_v39, %v757_v51  ;;  %v1375_v63 = vmul.f32 %v1155_v33, %v69_v58 }
  0x89   :  { %v49_v61 = vsel %vm47_vm0, %v1088_v14, %v1100_v17  ;;  %v55_v19 = vsel %vm47_vm0, %v1100_v17, %v1088_v14  ;;  %v1337_v14 = vstv %s1256_s15  ;;  %1882 = vst [vmem:[#allocation25_spill] sm:$0xff] %v1342_v18  ;;  %1883 = vst [vmem:[#allocation26_spill] sm:$0xff] %v1344_v10  ;;  %v1353_v17 = vrot.slane %v1307_v40, %v551_v55 }
  0x8a   :  { %v1126_v24 = vpop.permute.xlu1 %74  ;;  %1881 = vst [vmem:[#allocation24_spill] sm:$0xff] %v1337_v14  ;;  %v70_v9 = vmul.f32 %v1121_v22, %v55_v19  ;;  %v71_v5 = vmul.f32 %v1124_v23, %v49_v61  ;;  %v1361_v61 = vrot.slane %v748_v39, %v753_v12  ;;  %1886 = vst [vmem:[#allocation29_spill] sm:$0xff] %v1363_v11 }
  0x8b   :  { %1884 = vst [vmem:[#allocation27_spill] sm:$0xff] %v1353_v17  ;;  %v1366_v19 = vmul.f32 %v1152_v32, %v68_v3  ;;  %v1369_v14 = vmul.f32 %v1152_v32, %v69_v58  ;;  %v1372_v55 = vmul.f32 %v1155_v33, %v68_v3  ;;  %1888 = vst [vmem:[#allocation31_spill] sm:$0xff] %v1375_v63 }
  0x8c   :  { %v1157_v34 = vpop.permute.xlu0 %72  ;;  %1885 = vst [vmem:[#allocation28_spill] sm:$0xff] %v1361_v61  ;;  %v347_v3 = vadd.f32 %v343_v21, %v1113_v20  ;;  %v348_v39 = vadd.f32 %v344_v26, %v1113_v20  ;;  %v1392_v18 = vmul.f32 %v1152_v32, %v70_v9  ;;  %v1398_v17 = vmul.f32 %v1155_v33, %v70_v9 }
  0x8d   :  { %1887 = vst [vmem:[#allocation30_spill] sm:$0xff] %v1372_v55 }
  0x8e   :  { %v1182_v42 = vpop.permute.xlu1 %80  ;;  %1889 = vst [vmem:[#allocation32_spill] sm:$0xff] %v1398_v17 }
  0x8f   :  { %v84_v22 = vsel %vm82_vm1, %v1182_v42, %v1126_v24  ;;  %v90_v23 = vsel %vm82_vm1, %v1126_v24, %v1182_v42  ;;  %v345_v24 = vmul.f32 %v1135_v27, %v70_v9  ;;  %v346_v42 = vmul.f32 %v1135_v27, %v71_v5 }
  0x90   :  { %v1211_v52 = vpop.permute.xlu0 %78  ;;  %v106_v58 = vmul.f32 %v1129_v25, %v90_v23  ;;  %v107_v11 = vmul.f32 %v1138_v28, %v84_v22  ;;  %v1395_v27 = vmul.f32 %v1152_v32, %v71_v5 }
  0x91   :  { %v83_v51 = vsel %vm82_vm1, %v1211_v52, %v1157_v34  ;;  %v89_v12 = vsel %vm82_vm1, %v1157_v34, %v1211_v52  ;;  %v1401_v34 = vmul.f32 %v1155_v33, %v71_v5  ;;  %v349_v9 = vadd.f32 %v345_v24, %v1113_v20 }
  0x92   :  { %v1242_v62 = vpop.permute.xlu1 %110  ;;  %v104_v26 = vmul.f32 %v1129_v25, %v89_v12  ;;  %v105_v22 = vmul.f32 %v1138_v28, %v83_v51  ;;  %v350_v5 = vadd.f32 %v346_v42, %v1113_v20  ;;  %v355_v33 = vmul.f32 %v1160_v35, %v106_v58 }
  0x93   :  { %1890 = vst [vmem:[#allocation33_spill] sm:$0xff] %v1401_v34  ;;  %v356_v52 = vmul.f32 %v1160_v35, %v107_v11  ;;  %v1416_v21 = vmul.f32 %v1168_v37, %v106_v58  ;;  %v1419_v25 = vmul.f32 %v1168_v37, %v107_v11  ;;  %v1428_v42 = vmul.f32 %v1171_v38, %v106_v58 }
  0x94   :  { %v1268_v13 = vpop.permute.xlu0 %108  ;;  %v1431_v40 = vmul.f32 %v1171_v38, %v107_v11  ;;  %v353_v32 = vmul.f32 %v1160_v35, %v104_v26  ;;  %v354_v63 = vmul.f32 %v1160_v35, %v105_v22  ;;  %v1438_v51 = vmul.f32 %v1168_v37, %v104_v26 }
  0x95   :  { %1891 = vst [vmem:[#allocation34_spill] sm:$0xff] %v1428_v42  ;;  %v1441_v12 = vmul.f32 %v1168_v37, %v105_v22  ;;  %v359_v20 = vadd.f32 %v355_v33, %v349_v9  ;;  %v360_v24 = vadd.f32 %v356_v52, %v350_v5  ;;  %v1454_v60 = vmul.f32 %v1171_v38, %v104_v26 }
  0x96   :  { %v1292_v4 = vpop.permute.xlu1 %116  ;;  %1892 = vst [vmem:[#allocation35_spill] sm:$0xff] %v1431_v40  ;;  %v1457_v37 = vmul.f32 %v1171_v38, %v105_v22  ;;  %v357_v38 = vadd.f32 %v353_v32, %v347_v3  ;;  %v358_v22 = vadd.f32 %v354_v63, %v348_v39 }
  0x97   :  { %v120_v58 = vsel %vm118_vm2, %v1292_v4, %v1242_v62  ;;  %v126_v11 = vsel %vm118_vm2, %v1242_v62, %v1292_v4  ;;  %1893 = vst [vmem:[#allocation36_spill] sm:$0xff] %v1454_v60 }
  0x98   :  { %v1317_v6 = vpop.permute.xlu0 %114  ;;  %1894 = vst [vmem:[#allocation37_spill] sm:$0xff] %v1457_v37  ;;  %v142_v9 = vmul.f32 %v1141_v29, %v126_v11  ;;  %v143_v26 = vmul.f32 %v1144_v30, %v120_v58 }
  0x99   :  { %v119_v8 = vsel %vm118_vm2, %v1317_v6, %v1268_v13  ;;  %v125_v4 = vsel %vm118_vm2, %v1268_v13, %v1317_v6 }
  0x9a   :  { %v1329_v31 = vpop.permute.xlu1 %146  ;;  %v140_v35 = vmul.f32 %v1141_v29, %v125_v4  ;;  %v141_v13 = vmul.f32 %v1144_v30, %v119_v8  ;;  %v365_v8 = vmul.f32 %v1185_v43, %v142_v9  ;;  %v366_v30 = vmul.f32 %v1185_v43, %v143_v26 }
  0x9b   :  { %v1490_v32 = vmul.f32 %v1188_v44, %v142_v9  ;;  %v1498_v4 = vmul.f32 %v1191_v45, %v142_v9  ;;  %v1501_v52 = vmul.f32 %v1191_v45, %v143_v26 }
  0x9c   :  { %v1348_v2 = vpop.permute.xlu0 %144  ;;  %v363_v62 = vmul.f32 %v1185_v43, %v140_v35  ;;  %v364_v3 = vmul.f32 %v1185_v43, %v141_v13  ;;  %v1514_v9 = vmul.f32 %v1188_v44, %v140_v35  ;;  %v369_v43 = vadd.f32 %v365_v8, %v359_v20 }
  0x9d   :  { %1895 = vst [vmem:[#allocation38_spill] sm:$0xff] %v1498_v4  ;;  %1896 = vst [vmem:[#allocation39_spill] sm:$0xff] %v1501_v52 }
  0x9e   :  { %v1377_v10 = vpop.permute.xlu1 %152  ;;  %v368_v60 = vadd.f32 %v364_v3, %v358_v22 }
  0x9f   :  { %v156_v6 = vsel %vm154_vm3, %v1377_v10, %v1329_v31  ;;  %v162_v58 = vsel %vm154_vm3, %v1329_v31, %v1377_v10  ;;  %v1493_v10 = vmul.f32 %v1188_v44, %v143_v26  ;;  %v1517_v26 = vmul.f32 %v1188_v44, %v141_v13 }
  0xa0   :  { %v151_v61 = vpop.permute.xlu0 %150 }
  0xa1   :  { %v155_v39 = vsel %vm154_vm3, %v151_v61, %v1348_v2  ;;  %v161_v29 = vsel %vm154_vm3, %v1348_v2, %v151_v61  ;;  %v178_v2 = vmul.f32 %v1194_v46, %v162_v58  ;;  %v179_v61 = vmul.f32 %v1197_v47, %v156_v6 }
  0xa2   :  { %v1407_v23 = vpop.permute.xlu1 %197  ;;  %v1508_v63 = vmul.f32 %v1194_v46, %v161_v29  ;;  %v1511_v34 = vmul.f32 %v1197_v47, %v155_v39  ;;  %v1520_v6 = vmul.f32 %v1191_v45, %v140_v35  ;;  %v1523_v58 = vmul.f32 %v1191_v45, %v141_v13 }
  0xa3   :  { %v370_v46 = vadd.f32 %v366_v30, %v360_v24  ;;  %v375_v44 = vmul.f32 %v1200_v48, %v178_v2  ;;  %v376_v37 = vmul.f32 %v1200_v48, %v179_v61  ;;  %v367_v35 = vadd.f32 %v363_v62, %v357_v38 }
  0xa4   :  { %v1421_v28 = vpop.permute.xlu0 %195  ;;  %v373_v45 = vmul.f32 %v1200_v48, %v1508_v63  ;;  %v374_v24 = vmul.f32 %v1200_v48, %v1511_v34  ;;  %v1540_v40 = vmul.f32 %v1203_v49, %v178_v2  ;;  %v1543_v62 = vmul.f32 %v1203_v49, %v179_v61 }
  0xa5   :  { %v204_v38 = vsel %vm203_vm4, %v1421_v28, %v1407_v23  ;;  %v212_v48 = vsel %vm203_vm4, %v1407_v23, %v1421_v28  ;;  %v379_v3 = vadd.f32 %v375_v44, %v369_v43  ;;  %v380_v47 = vadd.f32 %v376_v37, %v370_v46 }
  0xa6   :  { %v1435_v55 = vpop.permute.xlu1 %201  ;;  %v1552_v30 = vmul.f32 %v1206_v50, %v178_v2  ;;  %v1555_v42 = vmul.f32 %v1206_v50, %v179_v61  ;;  %v377_v29 = vadd.f32 %v373_v45, %v367_v35  ;;  %v378_v8 = vadd.f32 %v374_v24, %v368_v60 }
  0xa7   :  { %v1564_v37 = vmul.f32 %v1214_v53, %v204_v38  ;;  %v1567_v2 = vmul.f32 %v1217_v54, %v212_v48 }
  0xa8   :  { %v1451_v17 = vpop.permute.xlu0 %199 }
  0xa9   :  { %v205_v13 = vsel %vm203_vm4, %v1451_v17, %v1435_v55  ;;  %v213_v23 = vsel %vm203_vm4, %v1435_v55, %v1451_v17  ;;  %v1577_v17 = vmul.f32 %v1203_v49, %v1508_v63  ;;  %v1581_v55 = vmul.f32 %v1203_v49, %v1511_v34 }
  0xaa   :  { %v1469_v5 = vpop.permute.xlu1 %233  ;;  %v1584_v44 = vmul.f32 %v1214_v53, %v205_v13  ;;  %v1587_v35 = vmul.f32 %v1217_v54, %v213_v23  ;;  %v1897_v54 = vrot.slane %v1163_v36, %v1063_v7  ;;  %v414_v23 = vmul.f32 %v1227_v57, %v1567_v2 }
  0xac   :  { %v232_v11 = vpop.permute.xlu0 %231  ;;  %v407_v48 = vadd.f32 %v1897_v54, %v377_v29  ;;  %v415_v36 = vmul.f32 %v1227_v57, %v1584_v44  ;;  %v1899_v54 = vld [vmem:[#allocation9_spill] sm:$0xff] }
  0xad   :  { %v240_v61 = vsel %vm239_vm5, %v232_v11, %v1469_v5  ;;  %v248_v60 = vsel %vm239_vm5, %v1469_v5, %v232_v11  ;;  %v410_v46 = vadd.f32 %v1899_v54, %v380_v47  ;;  %v1903_v54 = vld [vmem:[#allocation20_spill] sm:$0xff] }
  0xae   :  { %v1495_v31 = vpop.permute.xlu1 %237  ;;  %v1592_v45 = vmul.f32 %v1248_v0, %v240_v61  ;;  %v1595_v24 = vmul.f32 %v1251_v1, %v248_v60 }
  0xb0   :  { %v236_v33 = vpop.permute.xlu0 %235 }
  0xb1   :  { %v241_v49 = vsel %vm239_vm5, %v236_v33, %v1495_v31  ;;  %v249_v53 = vsel %vm239_vm5, %v1495_v31, %v236_v33 }
  0xb2   :  { %v270_v39 = vpop.permute.xlu1 %269  ;;  %v1622_v29 = vmul.f32 %v1248_v0, %v241_v49  ;;  %v1901_v49 = vld [vmem:[#allocation14_spill] sm:$0xff] }
  0xb4   :  { %v268_v20 = vpop.permute.xlu0 %267 }
  0xb5   :  { %v276_v5 = vsel %vm275_vm6, %v268_v20, %v270_v39  ;;  %v284_v11 = vsel %vm275_vm6, %v270_v39, %v268_v20  ;;  %v408_v39 = vadd.f32 %v1222_v56, %v378_v8  ;;  %v413_v20 = vmul.f32 %v1227_v57, %v1564_v37 }
  0xb6   :  { %v274_v22 = vpop.permute.xlu1 %273  ;;  %v1610_v61 = vmul.f32 %v1271_v15, %v276_v5  ;;  %v1613_v60 = vmul.f32 %v1274_v16, %v284_v11  ;;  %v416_v56 = vmul.f32 %v1227_v57, %v1587_v35  ;;  %v1625_v8 = vmul.f32 %v1251_v1, %v249_v53 }
  0xb7   :  { %v1898_v5 = vrot.slane %v1178_v41, %v1063_v7  ;;  %v417_v52 = vadd.f32 %v413_v20, %v407_v48  ;;  %v418_v57 = vadd.f32 %v414_v23, %v408_v39 }
  0xb8   :  { %v272_v28 = vpop.permute.xlu0 %271  ;;  %v433_v7 = vmul.f32 %v1901_v49, %v1610_v61  ;;  %v434_v41 = vmul.f32 %v1901_v49, %v1613_v60  ;;  %v420_v39 = vadd.f32 %v416_v56, %v410_v46 }
  0xb9   :  { %v277_v33 = vsel %vm275_vm6, %v272_v28, %v274_v22  ;;  %v285_v31 = vsel %vm275_vm6, %v274_v22, %v272_v28  ;;  %v409_v11 = vadd.f32 %v1898_v5, %v379_v3  ;;  %v1900_v22 = vld [vmem:[#allocation11_spill] sm:$0xff] }
  0xba   :  { %v306_v13 = vpop.permute.xlu1 %305  ;;  %v423_v28 = vmul.f32 %v1900_v22, %v1592_v45  ;;  %v424_v43 = vmul.f32 %v1900_v22, %v1595_v24  ;;  %v1636_v0 = vmul.f32 %v1271_v15, %v277_v33  ;;  %v1639_v1 = vmul.f32 %v1274_v16, %v285_v31  ;;  %v1902_v33 = vld [vmem:[#allocation17_spill] sm:$0xff] }
  0xbb   :  { %v419_v48 = vadd.f32 %v415_v36, %v409_v11  ;;  %v425_v15 = vmul.f32 %v1900_v22, %v1622_v29  ;;  %v426_v16 = vmul.f32 %v1900_v22, %v1625_v8 }
  0xbc   :  { %v304_v38 = vpop.permute.xlu0 %303  ;;  %v427_v20 = vadd.f32 %v423_v28, %v417_v52  ;;  %v428_v23 = vadd.f32 %v424_v43, %v418_v57  ;;  %v436_v46 = vmul.f32 %v1901_v49, %v1639_v1  ;;  %v1904_v52 = vld [vmem:[#allocation21_spill] sm:$0xff] }
  0xbd   :  { %v312_v47 = vsel %vm311_vm7, %v304_v38, %v306_v13  ;;  %v320_v3 = vsel %vm311_vm7, %v306_v13, %v304_v38  ;;  %v435_v13 = vmul.f32 %v1901_v49, %v1636_v0  ;;  %v429_v28 = vadd.f32 %v425_v15, %v419_v48  ;;  %v1905_v15 = vld [vmem:[#allocation8_spill] sm:$0xff] }
  0xbe   :  { %v310_v53 = vpop.permute.xlu1 %309  ;;  %v1652_v31 = vmul.f32 %v1902_v33, %v312_v47  ;;  %v1655_v4 = vmul.f32 %v1903_v54, %v320_v3  ;;  %v437_v56 = vadd.f32 %v433_v7, %v427_v20  ;;  %v438_v11 = vadd.f32 %v434_v41, %v428_v23 }
  0xbf   :  { %v430_v57 = vadd.f32 %v426_v16, %v420_v39  ;;  %v1675_v49 = vmul.f32 %v1206_v50, %v1508_v63  ;;  %v1679_v7 = vmul.f32 %v1206_v50, %v1511_v34  ;;  %v571_v16 = vmul.f32 %v1905_v15, %v1564_v37 }
  0xc0   :  { %v308_v5 = vpop.permute.xlu0 %307  ;;  %v443_v43 = vmul.f32 %v1904_v52, %v1652_v31  ;;  %v444_v22 = vmul.f32 %v1904_v52, %v1655_v4  ;;  %v572_v63 = vmul.f32 %v1905_v15, %v1567_v2  ;;  %v1906_v23 = vrot.slane %v1366_v19, 1 }
  0xc1   :  { %v313_v38 = vsel %vm311_vm7, %v308_v5, %v310_v53  ;;  %v321_v36 = vsel %vm311_vm7, %v310_v53, %v308_v5  ;;  %v439_v5 = vadd.f32 %v435_v13, %v429_v28  ;;  %v440_v20 = vadd.f32 %v436_v46, %v430_v57 }
  0xc2   :  { %v1668_v47 = vmul.f32 %v1902_v33, %v313_v38  ;;  %v1671_v3 = vmul.f32 %v1903_v54, %v321_v36  ;;  %v447_v41 = vadd.f32 %v443_v43, %v437_v56  ;;  %v448_v53 = vadd.f32 %v444_v22, %v438_v11 }
  0xc3   :  { %v1907_v34 = vrot.slane %v1369_v14, 1  ;;  %v527_v54 = vrot.slane %v1577_v17, 1  ;;  %v528_v13 = vrot.slane %v1581_v55, 1  ;;  %v573_v36 = vmul.f32 %v1905_v15, %v1584_v44  ;;  %v1910_v14 = vld [vmem:[#allocation12_spill] sm:$0xff] }
  0xc4   :  { %v445_v48 = vmul.f32 %v1904_v52, %v1668_v47  ;;  %v446_v39 = vmul.f32 %v1904_v52, %v1671_v3  ;;  %v469_v50 = vadd.f32 %v1906_v23, %v447_v41  ;;  %v574_v56 = vmul.f32 %v1905_v15, %v1587_v35 }
  0xc5   :  { %v470_v33 = vadd.f32 %v1907_v34, %v448_v53  ;;  %v1908_v11 = vrot.slane %v1438_v51, 1  ;;  %v1909_v19 = vrot.slane %v1441_v12, 1  ;;  %v593_v22 = vmul.f32 %v1910_v14, %v1592_v45 }
  0xc6   :  { %v449_v46 = vadd.f32 %v445_v48, %v439_v5  ;;  %v450_v38 = vadd.f32 %v446_v39, %v440_v20  ;;  %v594_v17 = vmul.f32 %v1910_v14, %v1595_v24  ;;  %v1911_v55 = vrot.slane %v1392_v18, 1 }
  0xc7   :  { %v491_v52 = vadd.f32 %v1908_v11, %v469_v50  ;;  %v492_v43 = vadd.f32 %v1909_v19, %v470_v33  ;;  %v1912_v57 = vrot.slane %v1395_v27, 1  ;;  %v579_v53 = vrot.slane %v571_v16, 1  ;;  %v1919_v19 = vld [vmem:[#allocation15_spill] sm:$0xff] }
  0xc8   :  { %v471_v28 = vadd.f32 %v1911_v55, %v449_v46  ;;  %v580_v5 = vrot.slane %v572_v63, 1  ;;  %v1913_v51 = vrot.slane %v1514_v9, 1  ;;  %v1914_v12 = vrot.slane %v1517_v26, 1 }
  0xc9   :  { %v472_v41 = vadd.f32 %v1912_v57, %v450_v38  ;;  %v595_v39 = vmul.f32 %v1910_v14, %v1622_v29  ;;  %v596_v15 = vmul.f32 %v1910_v14, %v1625_v8  ;;  %v1915_v18 = vrot.slane %v1416_v21, 1 }
  0xca   :  { %v513_v20 = vadd.f32 %v1913_v51, %v491_v52  ;;  %v514_v48 = vadd.f32 %v1914_v12, %v492_v43  ;;  %v1916_v27 = vrot.slane %v1419_v25, 1  ;;  %v581_v16 = vrot.slane %v573_v36, 1  ;;  %v1920_v25 = vld [vmem:[#allocation7_spill] sm:$0xff] }
  0xcb   :  { %v493_v23 = vadd.f32 %v1915_v18, %v471_v28  ;;  %v582_v63 = vrot.slane %v574_v56, 1  ;;  %v601_v33 = vrot.slane %v593_v22, 1  ;;  %v602_v46 = vrot.slane %v594_v17, 1 }
  0xcc   :  { %v494_v50 = vadd.f32 %v1916_v27, %v472_v41  ;;  %v535_v34 = vadd.f32 %v527_v54, %v513_v20  ;;  %v536_v9 = vadd.f32 %v528_v13, %v514_v48  ;;  %v1917_v26 = vrot.slane %v1490_v32, 1  ;;  %v1922_v54 = vld [vmem:[#allocation23_spill] sm:$0xff]  ;;  %v1925_v41 = vld [vmem:[#allocation22_spill] sm:$0xff] }
  0xcd   :  { %v1918_v11 = vrot.slane %v1493_v10, 1  ;;  %v615_v43 = vmul.f32 %v1919_v19, %v1610_v61  ;;  %v616_v21 = vmul.f32 %v1919_v19, %v1613_v60  ;;  %v1921_v36 = vrot.slane %v1298_v59, %v1920_v25  ;;  %v1926_v48 = vld [vmem:[#allocation19_spill] sm:$0xff] }
  0xce   :  { %v515_v38 = vadd.f32 %v1917_v26, %v493_v23  ;;  %v566_v13 = vadd.f32 %v1922_v54, %v536_v9  ;;  %v603_v14 = vrot.slane %v595_v39, 1  ;;  %v604_v22 = vrot.slane %v596_v15, 1 }
  0xcf   :  { %v516_v52 = vadd.f32 %v1918_v11, %v494_v50  ;;  %v565_v56 = vadd.f32 %v1921_v36, %v535_v34  ;;  %v1923_v32 = vrot.slane %v1540_v40, 1  ;;  %v1924_v10 = vrot.slane %v1543_v62, 1  ;;  %v1928_v62 = vld [vmem:[#allocation27_spill] sm:$0xff] }
  0xd0   :  { %v588_v57 = vadd.f32 %v580_v5, %v566_v13  ;;  %v637_v51 = vmul.f32 %v1925_v41, %v1652_v31  ;;  %v638_v20 = vmul.f32 %v1925_v41, %v1655_v4  ;;  %v617_v59 = vmul.f32 %v1919_v19, %v1636_v0 }
  0xd1   :  { %v537_v17 = vadd.f32 %v1923_v32, %v515_v38  ;;  %v538_v55 = vadd.f32 %v1924_v10, %v516_v52  ;;  %v587_v28 = vadd.f32 %v579_v53, %v565_v56  ;;  %v618_v12 = vmul.f32 %v1919_v19, %v1639_v1  ;;  %v1929_v32 = vld [vmem:[#allocation10_spill] sm:$0xff] }
  0xd2   :  { %v1927_v40 = vrot.slane %v1926_v48, %v1920_v25  ;;  %v623_v53 = vrot.slane %v615_v43, 1  ;;  %v624_v5 = vrot.slane %v616_v21, 1  ;;  %v610_v23 = vadd.f32 %v602_v46, %v588_v57 }
  0xd3   :  { %v568_v15 = vadd.f32 %v1928_v62, %v538_v55  ;;  %v609_v18 = vadd.f32 %v601_v33, %v587_v28  ;;  %v639_v34 = vmul.f32 %v1925_v41, %v1668_v47  ;;  %v640_v9 = vmul.f32 %v1925_v41, %v1671_v3  ;;  %v1930_v55 = vld [vmem:[#allocation30_spill] sm:$0xff] }
  0xd4   :  { %v567_v39 = vadd.f32 %v1927_v40, %v537_v17  ;;  %v632_v38 = vadd.f32 %v624_v5, %v610_v23  ;;  %v645_v11 = vrot.slane %v637_v51, 1  ;;  %v646_v52 = vrot.slane %v638_v20, 1  ;;  %v1936_v40 = vld [vmem:[#allocation37_spill] sm:$0xff] }
  0xd5   :  { %v590_v50 = vadd.f32 %v582_v63, %v568_v15  ;;  %v631_v26 = vadd.f32 %v623_v53, %v609_v18  ;;  %v625_v19 = vrot.slane %v617_v59, 1  ;;  %v626_v25 = vrot.slane %v618_v12, 1  ;;  %v1934_v12 = vld [vmem:[#allocation36_spill] sm:$0xff]  ;;  %v1938_v15 = vld [vmem:[#allocation13_spill] sm:$0xff] }
  0xd6   :  { %v589_v27 = vadd.f32 %v581_v16, %v567_v39  ;;  %v735_v43 = vrot.slane %v1552_v30, 2  ;;  %v736_v33 = vrot.slane %v1555_v42, 2  ;;  %v654_v63 = vadd.f32 %v646_v52, %v632_v38  ;;  %v1941_v23 = vld [vmem:[#allocation33_spill] sm:$0xff] }
  0xd7   :  { %v612_v56 = vadd.f32 %v604_v22, %v590_v50  ;;  %v653_v16 = vadd.f32 %v645_v11, %v631_v26  ;;  %v647_v54 = vrot.slane %v639_v34, 1  ;;  %v648_v13 = vrot.slane %v640_v9, 1  ;;  %v1932_v22 = vld [vmem:[#allocation31_spill] sm:$0xff]  ;;  %v1945_v11 = vld [vmem:[#allocation34_spill] sm:$0xff] }
  0xd8   :  { %v611_v36 = vadd.f32 %v603_v14, %v589_v27  ;;  %v777_v17 = vmul.f32 %v1929_v32, %v1564_v37  ;;  %v778_v10 = vmul.f32 %v1929_v32, %v1567_v2  ;;  %v1931_v28 = vrot.slane %v1930_v55, 2 }
  0xd9   :  { %v634_v21 = vadd.f32 %v626_v25, %v612_v56  ;;  %v1933_v57 = vrot.slane %v1932_v22, 2  ;;  %v733_v42 = vrot.slane %v1675_v49, 2  ;;  %v734_v41 = vrot.slane %v1679_v7, 2  ;;  %v1939_v7 = vld [vmem:[#allocation32_spill] sm:$0xff]  ;;  %v1947_v25 = vld [vmem:[#allocation35_spill] sm:$0xff] }
  0xda   :  { %v633_v46 = vadd.f32 %v625_v19, %v611_v36  ;;  %v675_v14 = vadd.f32 %v1931_v28, %v653_v16  ;;  %v779_v59 = vmul.f32 %v1929_v32, %v1584_v44  ;;  %v780_v37 = vmul.f32 %v1929_v32, %v1587_v35 }
  0xdb   :  { %v676_v30 = vadd.f32 %v1933_v57, %v654_v63  ;;  %v656_v20 = vadd.f32 %v648_v13, %v634_v21  ;;  %v1935_v2 = vrot.slane %v1934_v12, 2  ;;  %v1937_v39 = vrot.slane %v1936_v40, 2  ;;  %v1955_v57 = vld [vmem:[#allocation26_spill] sm:$0xff]  ;;  %v1956_v12 = vld [vmem:[#allocation24_spill] sm:$0xff] }
  0xdc   :  { %v655_v51 = vadd.f32 %v647_v54, %v633_v46  ;;  %v799_v53 = vmul.f32 %v1938_v15, %v1592_v45  ;;  %v800_v49 = vmul.f32 %v1938_v15, %v1595_v24  ;;  %v1940_v5 = vrot.slane %v1939_v7, 2  ;;  %v1957_v40 = vld [vmem:[#allocation28_spill] sm:$0xff] }
  0xdd   :  { %v697_v48 = vadd.f32 %v1935_v2, %v675_v14  ;;  %v698_v62 = vadd.f32 %v1937_v39, %v676_v30  ;;  %v1942_v44 = vrot.slane %v1941_v23, 2  ;;  %v785_v50 = vrot.slane %v777_v17, 2  ;;  %v1951_v17 = vld [vmem:[#allocation39_spill] sm:$0xff]  ;;  %v1954_v14 = vld [vmem:[#allocation25_spill] sm:$0xff] }
  0xde   :  { %v677_v18 = vadd.f32 %v1940_v5, %v655_v51  ;;  %v786_v35 = vrot.slane %v778_v10, 2  ;;  %v1943_v34 = vrot.slane %v1520_v6, 2  ;;  %v1944_v26 = vrot.slane %v1523_v58, 2  ;;  %v1949_v58 = vld [vmem:[#allocation38_spill] sm:$0xff] }
  0xdf   :  { %v678_v27 = vadd.f32 %v1942_v44, %v656_v20  ;;  %v801_v45 = vmul.f32 %v1938_v15, %v1622_v29  ;;  %v802_v24 = vmul.f32 %v1938_v15, %v1625_v8  ;;  %v1946_v52 = vrot.slane %v1945_v11, 2  ;;  %v1953_v8 = vld [vmem:[#allocation16_spill] sm:$0xff] }
  0xe0   :  { %v719_v9 = vadd.f32 %v1943_v34, %v697_v48  ;;  %v720_v38 = vadd.f32 %v1944_v26, %v698_v62  ;;  %v1948_v36 = vrot.slane %v1947_v25, 2  ;;  %v787_v16 = vrot.slane %v779_v59, 2  ;;  %v1958_v62 = vld [vmem:[#allocation29_spill] sm:$0xff]  ;;  %v1959_v34 = vld [vmem:[#allocation6_spill] sm:$0xff] }
  0xe1   :  { %v699_v19 = vadd.f32 %v1946_v52, %v677_v18  ;;  %v788_v63 = vrot.slane %v780_v37, 2  ;;  %v807_v21 = vrot.slane %v799_v53, 2  ;;  %v808_v54 = vrot.slane %v800_v49, 2 }
  0xe2   :  { %v700_v56 = vadd.f32 %v1948_v36, %v678_v27  ;;  %v741_v46 = vadd.f32 %v733_v42, %v719_v9  ;;  %v742_v6 = vadd.f32 %v734_v41, %v720_v38  ;;  %v1950_v13 = vrot.slane %v1949_v58, 2  ;;  %v1960_v9 = vld [vmem:[#allocation18_spill] sm:$0xff] }
  0xe3   :  { %v1952_v29 = vrot.slane %v1951_v17, 2  ;;  %v821_v55 = vmul.f32 %v1953_v8, %v1610_v61  ;;  %v822_v28 = vmul.f32 %v1953_v8, %v1613_v60  ;;  %v809_v42 = vrot.slane %v801_v45, 2 }
  0xe4   :  { %v721_v32 = vadd.f32 %v1950_v13, %v699_v19  ;;  %v771_v22 = vadd.f32 %v1954_v14, %v741_v46  ;;  %v772_v30 = vadd.f32 %v1955_v57, %v742_v6  ;;  %v810_v41 = vrot.slane %v802_v24, 2 }
  0xe5   :  { %v722_v10 = vadd.f32 %v1952_v29, %v700_v56  ;;  %v843_v2 = vmul.f32 %v1956_v12, %v1652_v31  ;;  %v844_v48 = vmul.f32 %v1956_v12, %v1655_v4  ;;  %v823_v61 = vmul.f32 %v1953_v8, %v1636_v0 }
  0xe6   :  { %v743_v51 = vadd.f32 %v735_v43, %v721_v32  ;;  %v793_v59 = vadd.f32 %v785_v50, %v771_v22  ;;  %v794_v37 = vadd.f32 %v786_v35, %v772_v30  ;;  %v824_v60 = vmul.f32 %v1953_v8, %v1639_v1 }
  0xe7   :  { %v744_v20 = vadd.f32 %v736_v33, %v722_v10  ;;  %v829_v43 = vrot.slane %v821_v55, 2  ;;  %v830_v33 = vrot.slane %v822_v28, 2  ;;  %v845_v31 = vmul.f32 %v1956_v12, %v1668_v47 }
  0xe8   :  { %v773_v39 = vadd.f32 %v1957_v40, %v743_v51  ;;  %v815_v53 = vadd.f32 %v807_v21, %v793_v59  ;;  %v816_v49 = vadd.f32 %v808_v54, %v794_v37  ;;  %v846_v4 = vmul.f32 %v1956_v12, %v1671_v3 }
  0xe9   :  { %v774_v15 = vadd.f32 %v1958_v62, %v744_v20  ;;  %v851_v23 = vrot.slane %v843_v2, 2  ;;  %v852_v1 = vrot.slane %v844_v48, 2  ;;  %v831_v44 = vrot.slane %v823_v61, 2 }
  0xea   :  { %v795_v7 = vadd.f32 %v787_v16, %v773_v39  ;;  %v837_v0 = vadd.f32 %v829_v43, %v815_v53  ;;  %v838_v18 = vadd.f32 %v830_v33, %v816_v49  ;;  %v832_v27 = vrot.slane %v824_v60, 2 }
  0xeb   :  { %v796_v5 = vadd.f32 %v788_v63, %v774_v15  ;;  %v1961_v26 = vunpack.c.0.s8 %v1960_v9  ;;  %v853_v47 = vrot.slane %v845_v31, 2  ;;  %v854_v19 = vrot.slane %v846_v4, 2 }
  0xec   :  { %v817_v50 = vadd.f32 %v809_v42, %v795_v7  ;;  %v859_v45 = vadd.f32 %v851_v23, %v837_v0  ;;  %v860_v24 = vadd.f32 %v852_v1, %v838_v18  ;;  %v1962_v16 = vlaneseq }
  0xed   :  { %v818_v35 = vadd.f32 %v810_v41, %v796_v5  ;;  %v873_v38 = vsub.s32 %v1961_v26, %v1959_v34 }
  0xee   :  { %v839_v11 = vadd.f32 %v831_v44, %v817_v50  ;;  %v867_v25 = vcombine.low %v859_v45, %v860_v24  ;;  %vm901_vm8 = vcmp.lt.s32.totalorder %v1962_v16, 256 }
  0xef   :  { %v840_v52 = vadd.f32 %v832_v27, %v818_v35 }
  0xf0   :  { %v861_v3 = vadd.f32 %v853_v47, %v839_v11  ;;  %v874_v56 = vrot.slane %v867_v25, %v873_v38 }
  0xf1   :  { %v862_v36 = vadd.f32 %v854_v19, %v840_v52 }
  0xf2   :  { %v881_v46 = vrot.slane %v874_v56, %v873_v38 }
  0xf3   :  { %v882_v63 = vcombine.low %v861_v3, %v862_v36 }
  0xf4   :  { %903 = vst.msk [vmem:[%s1833_s4] sm:$0x3] %vm901_vm8, %v881_v46 }
  0xf5   :  { %v889_v6 = vrot.slane %v882_v63, %v873_v38 }
  0xf7   :  { %v896_v21 = vrot.slane %v889_v6, %v873_v38 }
  0xf9   :  { %904 = vst.msk [vmem:[%s1833_s4 + $0x2] sm:$0x3] %vm901_vm8, %v896_v21 }
  0xfa   :  { %909 = vsyncpa [#allocation4], 1 }

</bundles_post_ra>
